<compile_context>
chip_gen: v5e
topology: v5e:2x2
jax: 0.10.0
libtpu: 0.0.40
codegen_flags: <defaults>
</compile_context>

<pallas_src>
import jax
import jax.numpy as jnp
from jax.experimental import pallas as pl
from jax.experimental.pallas import tpu as pltpu


def _round_up(x, m):
    return ((x + m - 1) // m) * m


def _cdiv(a, b):
    return -(-a // b)


def _critic_kernel(x_ref, w1_ref, b1_ref, w2_ref, b2_ref, out_ref):
    # x_ref: (TB, D)   w1_ref: (D, H)   b1_ref: (1, H)   w2_ref: (1, H)
    # b2_ref: (1, 1) in SMEM            out_ref: (1, TB)  (lane-dense row)
    x = x_ref[...]

    # Layer 1 on the MXU, f32 accumulation (x/w1 may be bf16).
    h = jnp.dot(x, w1_ref[...], preferred_element_type=jnp.float32)
    h = jnp.maximum(h + b1_ref[...], 0.0)                       # bias + ReLU (VPU, f32)

    # Layer 2 on the MXU, contracting H: (1, H) x (TB, H)^T -> (1, TB).
    # Result is already lane-dense, so the store is an unmasked vst.
    y = jax.lax.dot_general(
        w2_ref[...], h,
        dimension_numbers=(((1,), (1,)), ((), ())),
        preferred_element_type=jnp.float32,
    )
    out_ref[...] = (y + b2_ref[0, 0]).astype(out_ref.dtype)


def critic_forward(state, w1, b1, w2, b2, *, block_b=8192, stream_bf16=False):
    """state: (B, state_dim) f32. Returns (B, 1) f32.

    w1: (state_dim, 128), b1: (128,), w2: (128, 1), b2: (1,)
    """
    B, D = state.shape
    H = w1.shape[1]

    # Row-count multiple: sublane (8) / packed-sublane (16 for bf16); once the
    # batch is large enough, round tiles to 128 so the (1, TB) output row is
    # a whole number of lanes.
    mult = 16 if stream_bf16 else 8
    if B >= 128:
        mult = 128

    B_al = _round_up(B, mult)

    # Balanced batch tiles:
    #   * each at most block_b rows (amortizes per-grid-step overhead),
    #   * >= 2 tiles (and an even count) when the batch allows it, so the
    #     "parallel" axis shards evenly across v7x's two TensorCores.
    num_tiles = _cdiv(B_al, block_b)
    if num_tiles == 1 and B_al >= 2 * mult:
        num_tiles = 2
    elif num_tiles > 1 and num_tiles % 2 == 1:
        num_tiles += 1
    TB = _round_up(_cdiv(B_al, num_tiles), mult)
    B_pad = TB * num_tiles

    if B_pad != B:
        state = jnp.pad(state, ((0, B_pad - B), (0, 0)))

    if stream_bf16:
        # Halve HBM traffic for the streamed state; MXU accumulates in f32.
        state_in = state.astype(jnp.bfloat16)
        w1_in = w1.astype(jnp.bfloat16)
    else:
        state_in = state.astype(jnp.float32)
        w1_in = w1.astype(jnp.float32)

    b1_row = b1.reshape(1, H).astype(jnp.float32)
    w2_row = w2.reshape(1, H).astype(jnp.float32)   # (H,1) -> lane-dense row
    b2_s = b2.reshape(1, 1).astype(jnp.float32)     # scalar via SMEM

    out2d = pl.pallas_call(
        _critic_kernel,
        out_shape=jax.ShapeDtypeStruct((num_tiles, TB), jnp.float32),
        grid_spec=pl.GridSpec(
            grid=(num_tiles,),
            in_specs=[
                pl.BlockSpec((TB, D), lambda i: (i, 0)),   # streamed state tile
                pl.BlockSpec((D, H), lambda i: (0, 0)),    # W1 resident
                pl.BlockSpec((1, H), lambda i: (0, 0)),    # b1 resident
                pl.BlockSpec((1, H), lambda i: (0, 0)),    # W2 (row) resident
                pl.BlockSpec(memory_space=pltpu.MemorySpace.SMEM),  # b2 scalar
            ],
            out_specs=pl.BlockSpec((1, TB), lambda i: (i, 0)),       # lane-dense row
        ),
        compiler_params=pltpu.CompilerParams(
            dimension_semantics=("parallel",),
        ),
    )(state_in, w1_in, b1_row, w2_row, b2_s)

    # (num_tiles, TB) -> flat padded batch -> (B, 1)
    return out2d.reshape(-1)[:B].reshape(B, 1)


def init_critic_params(key, state_dim, hidden=128):
    """Deterministic init mimicking PyTorch nn.Linear default (U[-1/sqrt(fan_in), +])."""
    k1, k2, k3, k4 = jax.random.split(key, 4)
    bound1 = 1.0 / jnp.sqrt(state_dim)
    bound2 = 1.0 / jnp.sqrt(hidden)
    w1 = jax.random.uniform(k1, (state_dim, hidden), jnp.float32, -bound1, bound1)
    b1 = jax.random.uniform(k2, (hidden,), jnp.float32, -bound1, bound1)
    w2 = jax.random.uniform(k3, (hidden, 1), jnp.float32, -bound2, bound2)
    b2 = jax.random.uniform(k4, (1,), jnp.float32, -bound2, bound2)
    return w1, b1, w2, b2


def _reference(state, w1, b1, w2, b2):
    return jnp.maximum(state @ w1 + b1, 0.0) @ w2 + b2


if __name__ == "__main__":
    key = jax.random.PRNGKey(0)
    k_state, k_params = jax.random.split(key)

    B, STATE_DIM, HIDDEN = 8, 32, 128
    w1, b1, w2, b2 = init_critic_params(k_params, STATE_DIM, HIDDEN)

    # 1) Small batch, f32 path (single tile).
    state = jax.random.normal(k_state, (B, STATE_DIM), jnp.float32)
    out = jax.block_until_ready(critic_forward(state, w1, b1, w2, b2))
    ref = _reference(state, w1, b1, w2, b2)
    assert out.shape == (B, 1)
    assert jnp.allclose(out, ref, atol=1e-5, rtol=1e-5), "mismatch vs reference (small)"

    # 2) Larger, non-multiple batch: exercises the multi-tile (megacore) split,
    #    padding, and the lane-dense (1, TB) output path.
    B2 = 300
    state2 = jax.random.normal(jax.random.PRNGKey(1), (B2, STATE_DIM), jnp.float32)
    out2 = jax.block_until_ready(critic_forward(state2, w1, b1, w2, b2))
    ref2 = _reference(state2, w1, b1, w2, b2)
    assert out2.shape == (B2, 1)
    assert jnp.allclose(out2, ref2, atol=1e-5, rtol=1e-5), "mismatch vs reference (large)"

    # 3) bf16-streamed state/w1 (f32 accumulation & epilogue), looser tolerance
    #    against a bf16-cast reference.
    out3 = jax.block_until_ready(
        critic_forward(state2, w1, b1, w2, b2, stream_bf16=True))
    state2_bf = state2.astype(jnp.bfloat16).astype(jnp.float32)
    w1_bf = w1.astype(jnp.bfloat16).astype(jnp.float32)
    ref3 = jnp.maximum(state2_bf @ w1_bf + b1, 0.0) @ w2 + b2
    assert out3.shape == (B2, 1)
    assert jnp.allclose(out3, ref3, atol=5e-3, rtol=5e-3), "mismatch vs reference (bf16)"

    print("KERNEL_OK")
</pallas_src>

<mosaic_0001>
module attributes {stable_mosaic.version = 11 : i64} {
  func.func @_critic_kernel(%arg0: i32, %arg1: memref<8x32xf32, #tpu.memory_space<vmem>>, %arg2: memref<32x128xf32, #tpu.memory_space<vmem>>, %arg3: memref<1x128xf32, #tpu.memory_space<vmem>>, %arg4: memref<1x128xf32, #tpu.memory_space<vmem>>, %arg5: memref<1x1xf32, #tpu.memory_space<smem>>, %arg6: memref<1x8xf32, #tpu.memory_space<vmem>>) attributes {dimension_semantics = [#tpu.dimension_semantics<parallel>], iteration_bounds = array<i64: 1>, scalar_prefetch = 0 : i64, scratch_operands = 0 : i64, tpu.core_type = #tpu.core_type<tc>, window_params = [{transform_indices = @transform_0, window_bounds = array<i64: 8, 32>}, {pipeline_mode = #tpu.pipeline_mode<synchronous>, transform_indices = @transform_1, window_bounds = array<i64: 32, 128>}, {pipeline_mode = #tpu.pipeline_mode<synchronous>, transform_indices = @transform_2, window_bounds = array<i64: 1, 128>}, {pipeline_mode = #tpu.pipeline_mode<synchronous>, transform_indices = @transform_3, window_bounds = array<i64: 1, 128>}, {transform_indices = @transform_4, window_bounds = array<i64: 1, 1>}, {transform_indices = @transform_5, window_bounds = array<i64: 1, 8>}]} {
    %c0 = arith.constant 0 : index
    %c0_0 = arith.constant 0 : index
    %0 = vector.load %arg1[%c0, %c0_0] : memref<8x32xf32, #tpu.memory_space<vmem>>, vector<8x32xf32>
    %c0_1 = arith.constant 0 : index
    %c0_2 = arith.constant 0 : index
    %1 = vector.load %arg2[%c0_1, %c0_2] : memref<32x128xf32, #tpu.memory_space<vmem>>, vector<32x128xf32>
    %cst = arith.constant dense<0.000000e+00> : vector<8x128xf32>
    %2 = tpu.matmul %0, %1, %cst {dimension_numbers = #tpu.dot_dimension_numbers<[1], [0], [0], [1], [0, 0, 1, 1], [], []>} : vector<8x32xf32>, vector<32x128xf32>, vector<8x128xf32> -> vector<8x128xf32>
    %c0_3 = arith.constant 0 : index
    %c0_4 = arith.constant 0 : index
    %3 = vector.load %arg3[%c0_3, %c0_4] : memref<1x128xf32, #tpu.memory_space<vmem>>, vector<1x128xf32>
    %4 = vector.broadcast %3 : vector<1x128xf32> to vector<8x128xf32>
    %5 = arith.addf %2, %4 : vector<8x128xf32>
    %cst_5 = arith.constant 0.000000e+00 : f32
    %6 = vector.broadcast %cst_5 : f32 to vector<8x128xf32>
    %7 = arith.maximumf %5, %6 : vector<8x128xf32>
    %c0_6 = arith.constant 0 : index
    %c0_7 = arith.constant 0 : index
    %8 = vector.load %arg4[%c0_6, %c0_7] : memref<1x128xf32, #tpu.memory_space<vmem>>, vector<1x128xf32>
    %cst_8 = arith.constant dense<0.000000e+00> : vector<1x8xf32>
    %9 = tpu.matmul %8, %7, %cst_8 {dimension_numbers = #tpu.dot_dimension_numbers<[1], [1], [0], [0], [0, 0, 1, 0], [], []>} : vector<1x128xf32>, vector<8x128xf32>, vector<1x8xf32> -> vector<1x8xf32>
    %c0_9 = arith.constant 0 : index
    %c0_10 = arith.constant 0 : index
    %10 = memref.load %arg5[%c0_9, %c0_10] : memref<1x1xf32, #tpu.memory_space<smem>>
    %11 = vector.broadcast %10 : f32 to vector<1x8xf32>
    %12 = arith.addf %9, %11 : vector<1x8xf32>
    %c0_11 = arith.constant 0 : index
    %c0_12 = arith.constant 0 : index
    %13 = vector.load %arg6[%c0_11, %c0_12] : memref<1x8xf32, #tpu.memory_space<vmem>>, vector<1x8xf32>
    tpu.vector_store %arg6[%c0_11, %c0_12], %12 {strides = array<i32>} : memref<1x8xf32, #tpu.memory_space<vmem>>, vector<1x8xf32>,
    return
  }
  func.func @transform_0(%arg0: i32) -> (i32, i32) {
    %c0_i32 = arith.constant 0 : i32
    %c0_i32_0 = arith.constant 0 : i32
    return %arg0, %c0_i32 : i32, i32
  }
  func.func @transform_1(%arg0: i32) -> (i32, i32) {
    %c0_i32 = arith.constant 0 : i32
    %c0_i32_0 = arith.constant 0 : i32
    %c0_i32_1 = arith.constant 0 : i32
    return %c0_i32, %c0_i32_0 : i32, i32
  }
  func.func @transform_2(%arg0: i32) -> (i32, i32) {
    %c0_i32 = arith.constant 0 : i32
    %c0_i32_0 = arith.constant 0 : i32
    %c0_i32_1 = arith.constant 0 : i32
    return %c0_i32, %c0_i32_0 : i32, i32
  }
  func.func @transform_3(%arg0: i32) -> (i32, i32) {
    %c0_i32 = arith.constant 0 : i32
    %c0_i32_0 = arith.constant 0 : i32
    %c0_i32_1 = arith.constant 0 : i32
    return %c0_i32, %c0_i32_0 : i32, i32
  }
  func.func @transform_4(%arg0: i32) -> (i32, i32) {
    %c0_i32 = arith.constant 0 : i32
    %c0_i32_0 = arith.constant 0 : i32
    %c0_i32_1 = arith.constant 0 : i32
    return %c0_i32, %c0_i32_0 : i32, i32
  }
  func.func @transform_5(%arg0: i32) -> (i32, i32) {
    %c0_i32 = arith.constant 0 : i32
    %c0_i32_0 = arith.constant 0 : i32
    return %arg0, %c0_i32 : i32, i32
  }
}

</mosaic_0001>

<bundles_post_ra>
// kernel: tpu_custom_call.1
= control target key start
LH: loop header
LB: loop body
LE: loop exit
PB: predicated region body
PF: predicated region fallthrough
CT: control target
= control target key end

     0   :  { %11 = vsyncpa [#allocation4], 0  ;;  %s267_s0 = inlined_call_operand.hbm [shape: f32[8,32], index: 0, kind: input, shape index: {}]   ;;  %s268_s1 = inlined_call_operand.hbm [shape: f32[32,128], index: 1, kind: input, shape index: {}]   ;;  %s269_s2 = inlined_call_operand.vmem [shape: f32[1,128], index: 2, kind: input, shape index: {}]   ;;  %s270_s3 = inlined_call_operand.vmem [shape: f32[1,128], index: 3, kind: input, shape index: {}]   ;;  %s271_s4 = inlined_call_operand.<no memory space> [shape: f32[1,1], index: 4, kind: input, shape index: {}]   ;;  %s272_s5 = inlined_call_operand.hbm [shape: f32[1,8], index: 5, kind: output, shape index: {}]  }
   0x1   :  { %12 = vsyncpa [#allocation7], 0 }
   0x2   :  { %13 = vsyncpa [#allocation5], 0  ;;  %s19_s20 = sshll.u32 %s267_s0, 4  ;;  %s214_s21 = smov [#allocation3]   ;;  %s20_s20 = int_to_ptr.hbm [resolvable:$true] %s19_s20 }
   0x3   :  { %s21_s22 = sshll.u32 %s214_s21, 4  ;;  %s29_s25 = sshll.u32 %s268_s1, 4  ;;  %s22_s22 = int_to_ptr.vmem [resolvable:$true] %s21_s22  ;;  %s30_s25 = int_to_ptr.hbm [resolvable:$true] %s29_s25 }
   0x4   :  { %24 = dma.hbm_to_vmem [thread:$0]  %s20_s20, 128, %s22_s22, [#allocation4]  }
   0x5   :  { %s215_s26 = smov [#allocation6]   ;;  %s216_s28 = smov 128  }
   0x6   :  { %s31_s27 = sshll.u32 %s215_s26, 4  ;;  %s217_s29 = smov 8   ;;  %s32_s27 = int_to_ptr.vmem [resolvable:$true] %s31_s27 }
   0x7   :  { %37 = dma.hbm_to_vmem [thread:$0]  %s30_s25, 512, %s32_s27, [#allocation7], %s216_s28, %s216_s28, %s217_s29  }
   0x8   :  { %208 = dma.done.wait [#allocation4], 128  }
   0x9   :  { %209 = vsyncadd [#allocation4], 4294967168 }
   0xa   :  { %210 = dma.done.wait [#allocation7], 512  }
   0xb   :  { %211 = vsyncadd [#allocation7], 4294966784  ;;  %v56_v0 = vld [vmem:[#allocation6 + $0x18] sm:$0xff]  ;;  %v55_v1 = vld [vmem:[#allocation6 + $0x10] sm:$0xff]  ;;  %vm61_vm0 = vcmask 261120   ;;  %v88_v10 = vstv %s271_s4  ;;  %s218_s9 = smov [#allocation8]  }
   0xc   :  { %77 = vmatpush.msra.mxu0 %v56_v0  ;;  %v54_v2 = vld [vmem:[#allocation6 + $0x8] sm:$0xff]  ;;  %v53_v3 = vld [vmem:[#allocation6] sm:$0xff]  ;;  %v52_v4 = vld [vmem:[#allocation3] sm:$0xff]  ;;  %s116_s10 = sshll.u32 %s218_s9, 4  ;;  %s118_s13 = sshll.u32 %s272_s5, 4  ;;  %vm109_vm1 = vcmask 57344   ;;  %s117_s10 = int_to_ptr.vmem [resolvable:$true] %s116_s10  ;;  %s119_s13 = int_to_ptr.hbm [resolvable:$true] %s118_s13 }
   0xd   :  { %v135_v5 = vld [vmem:[%s269_s2] ss:$0 sm:$0xff] }
   0xe   :  { %78 = vmatpush.msra.mxu0 %v55_v1  ;;  %v86_v9 = vld [vmem:[%s270_s3] sm:$0x1] }
  0x10   :  { %79 = vmatpush.msra.mxu0 %v54_v2 }
  0x12   :  { %80 = vmatpush.msra.mxu0 %v53_v3 }
  0x13   :  { %129 = vmatmul.msk.f32.vlgmr.msra.gmra.mxu0 %vm61_vm0, %v52_v4 }
  0x90   :  { %v82_v6 = vpop.f32.mrf.mxu0 }
  0x91   :  { %v83_v7 = vadd.f32 %v135_v5, %v82_v6 }
  0x93   :  { %v85_v8 = vmax.f32 %v83_v7, 0.0 }
  0x95   :  { %104 = vmatpush.xpose.msra.mxu1 %v85_v8 }
  0x98   :  { %105 = vmatmul.f32.vlgmr.msra.gmra.mxu1 %v86_v9 }
 0x115   :  { %v106_v11 = vpop.f32.mrf.mxu1 }
 0x116   :  { %v107_v12 = vadd.f32 %v106_v11, %v88_v10 }
 0x118   :  { %110 = vst.msk [vmem:[#allocation8] sm:$0x1] %vm109_vm1, %v107_v12 }
 0x119   :  { %121 = dma.vmem_to_hbm [thread:$0]  %s117_s10, 16, %s119_s13, [#allocation5]  }
 0x11a   :  { %212 = dma.done.wait [#allocation5], 16  }
 0x11b   :  { %213 = vsyncadd [#allocation5], 4294967280 }
 0x11c   :  { %126 = vsyncpa [#allocation4], 1 }
 0x11d   :  { %127 = vsyncpa [#allocation7], 1 }
 0x11e   :  { %128 = vsyncpa [#allocation5], 1 }

</bundles_post_ra>
